<compile_context>
chip_gen: v7x
topology: tpu7x:2x2x1
jax: 0.10.0
libtpu: 0.0.40
codegen_flags: <defaults>
</compile_context>

<pallas_src>
import numpy as np
import jax
import jax.numpy as jnp
from jax.experimental import pallas as pl
from jax.experimental.pallas import tpu as pltpu

# ------------------------- static problem sizes (small run) ------------------
IMG = 16                 # input spatial size (1 channel)
C1 = 16                  # conv1 out channels
C2 = 16                  # conv2 out channels
H1 = IMG - 2             # 14  conv1 output spatial
P1 = H1 // 2             # 7   pooled spatial
H2 = P1 - 2              # 5   conv2 output spatial
L1 = H1 * C1             # 224 lane width after conv1  (col = w*C1 + c)
LP = P1 * C1             # 112 lane width after pool
L2 = H2 * C2             # 80  lane width after conv2
HID = 128                # fc1 hidden
FC_IN = C2 * H2 * H2     # 400 (would be 181104 at the original image size)


# -----------------------------------------------------------------------------
# Single fused kernel: conv1+ReLU -> maxpool -> conv2+ReLU -> flatten ->
#                      Linear -> (Dropout: identity) -> Linear -> Sigmoid
# Per grid step = one batch element.  All contractions are 2D MXU matmuls.
# -----------------------------------------------------------------------------
def _fused_forward_kernel(x_ref, m1_ref, b1_ref, r_ref, s_ref, m2_ref, b2_ref,
                          fw1_ref, fb1_ref, fw2_ref, fb2_ref, o_ref):
    x = x_ref[0]                                              # (16, 16)

    # ---- Conv2d(1,16,3x3) + bias + ReLU : y1[h, w*16 + co], shape (14, 224)
    y1 = jnp.dot(x[0:H1, :], m1_ref[0], preferred_element_type=jnp.float32)
    y1 = y1 + jnp.dot(x[1:H1 + 1, :], m1_ref[1], preferred_element_type=jnp.float32)
    y1 = y1 + jnp.dot(x[2:H1 + 2, :], m1_ref[2], preferred_element_type=jnp.float32)
    y1 = jnp.maximum(y1 + b1_ref[...], 0.0)

    # ---- MaxPool2d(2,2) fused in-kernel via exact 0/1 selection matmuls
    # vertical (rows 2h vs 2h+1), then horizontal (cols 2w vs 2w+1 per channel)
    vm = jnp.maximum(
        jnp.dot(r_ref[0], y1, preferred_element_type=jnp.float32),
        jnp.dot(r_ref[1], y1, preferred_element_type=jnp.float32))      # (7, 224)
    pool = jnp.maximum(
        jnp.dot(vm, s_ref[0], preferred_element_type=jnp.float32),
        jnp.dot(vm, s_ref[1], preferred_element_type=jnp.float32))      # (7, 112)

    # ---- Conv2d(16,16,3x3) + bias + ReLU : y2[h, w*16 + co], shape (5, 80)
    y2 = jnp.dot(pool[0:H2, :], m2_ref[0], preferred_element_type=jnp.float32)
    y2 = y2 + jnp.dot(pool[1:H2 + 1, :], m2_ref[1], preferred_element_type=jnp.float32)
    y2 = y2 + jnp.dot(pool[2:H2 + 2, :], m2_ref[2], preferred_element_type=jnp.float32)
    y2 = jnp.maximum(y2 + b2_ref[...], 0.0)

    # ---- Flatten (torch NCHW order folded into the pre-permuted fc1 weight)
    #      + Linear(FC_IN, 128) + bias
    h = fb1_ref[...]                                          # (1, 128)
    for hh in range(H2):                                      # static unroll (5)
        h = h + jnp.dot(y2[hh:hh + 1, :], fw1_ref[hh],
                        preferred_element_type=jnp.float32)
    # TODO(synk): Dropout(0.2) identity in eval; no mask applied.

    # ---- Linear(128, 1) + numerically stable Sigmoid
    z = jnp.sum(h * fw2_ref[...], axis=1, keepdims=True) + fb2_ref[...]   # (1, 1)
    t = 1.0 / (1.0 + jnp.exp(-jnp.abs(z)))
    res = jnp.where(z >= 0.0, t, 1.0 - t)                     # (1, 1)

    # lane-dense (unmasked) store; wrapper slices column 0
    o_ref[...] = jnp.broadcast_to(res, (1, 1, HID))


# -----------------------------------------------------------------------------
# Host-side, one-time parameter packing (banded conv matrices, pool selection
# matrices, row-permuted fc1).  Plain numpy - runs once at init.
# -----------------------------------------------------------------------------
def pack_params(tp):
    w1 = np.asarray(tp["conv1_w"], np.float32)   # (C1, 1, 3, 3)
    b1 = np.asarray(tp["conv1_b"], np.float32)   # (C1,)
    w2 = np.asarray(tp["conv2_w"], np.float32)   # (C2, C1, 3, 3)
    b2 = np.asarray(tp["conv2_b"], np.float32)   # (C2,)
    fw1 = np.asarray(tp["fc1_w"], np.float32)    # (FC_IN, HID)
    fb1 = np.asarray(tp["fc1_b"], np.float32)    # (HID,)
    fw2 = np.asarray(tp["fc2_w"], np.float32)    # (HID, 1)
    fb2 = np.asarray(tp["fc2_b"], np.float32)    # (1,)

    # conv1 banded matrices: y1[h, w*C1+co] = sum_di x[h+di,:] @ m1[di]
    m1 = np.zeros((3, IMG, L1), np.float32)
    for di in range(3):
        for w in range(H1):
            for dj in range(3):
                m1[di, w + dj, w * C1:(w + 1) * C1] = w1[:, 0, di, dj]

    # maxpool row / column selection matrices (exact 0/1 gathers)
    rsel = np.zeros((2, P1, H1), np.float32)
    for h in range(P1):
        rsel[0, h, 2 * h] = 1.0
        rsel[1, h, 2 * h + 1] = 1.0
    ssel = np.zeros((2, L1, LP), np.float32)
    for w in range(P1):
        for c in range(C1):
            ssel[0, (2 * w) * C1 + c, w * C1 + c] = 1.0
            ssel[1, (2 * w + 1) * C1 + c, w * C1 + c] = 1.0

    # conv2 banded matrices: y2[h, w*C2+co] = sum_di pool[h+di,:] @ m2[di]
    m2 = np.zeros((3, LP, L2), np.float32)
    for di in range(3):
        for w in range(H2):
            for dj in range(3):
                for ci in range(C1):
                    m2[di, (w + dj) * C1 + ci, w * C2:(w + 1) * C2] = w2[:, ci, di, dj]

    # fc1 weight permuted so the (h, w*C2+co) layout feeds it directly while
    # matching torch's NCHW flatten order (idx = co*25 + h*5 + w)
    fw1p = np.zeros((H2, L2, HID), np.float32)
    for h in range(H2):
        for w in range(H2):
            for co in range(C2):
                fw1p[h, w * C2 + co, :] = fw1[co * H2 * H2 + h * H2 + w, :]

    return {
        "m1": jnp.asarray(m1),
        "b1row": jnp.asarray(np.tile(b1, H1)[None, :]),    # (1, 224)
        "rsel": jnp.asarray(rsel),                          # (2, 7, 14)
        "ssel": jnp.asarray(ssel),                          # (2, 224, 112)
        "m2": jnp.asarray(m2),                              # (3, 112, 80)
        "b2row": jnp.asarray(np.tile(b2, H2)[None, :]),     # (1, 80)
        "fw1p": jnp.asarray(fw1p),                          # (5, 80, 128)
        "fb1": jnp.asarray(fb1[None, :]),                   # (1, 128)
        "fw2row": jnp.asarray(fw2[:, 0][None, :]),          # (1, 128)
        "fb2": jnp.asarray(fb2[None, :]),                   # (1, 1)
    }


def init_torch_like_params(key):
    ks = jax.random.split(key, 8)
    return {
        "conv1_w": 0.20 * jax.random.normal(ks[0], (C1, 1, 3, 3), jnp.float32),
        "conv1_b": 0.10 * jax.random.normal(ks[1], (C1,), jnp.float32),
        "conv2_w": 0.08 * jax.random.normal(ks[2], (C2, C1, 3, 3), jnp.float32),
        "conv2_b": 0.08 * jax.random.normal(ks[3], (C2,), jnp.float32),
        "fc1_w": 0.05 * jax.random.normal(ks[4], (FC_IN, HID), jnp.float32),
        "fc1_b": 0.05 * jax.random.normal(ks[5], (HID,), jnp.float32),
        "fc2_w": 0.10 * jax.random.normal(ks[6], (HID, 1), jnp.float32),
        "fc2_b": 0.10 * jax.random.normal(ks[7], (1,), jnp.float32),
    }


# -----------------------------------------------------------------------------
# Forward: one fused pallas_call, grid over batch ("parallel" -> v7x megacore).
# -----------------------------------------------------------------------------
@jax.jit
def forward(packed, x_nchw):
    n = x_nchw.shape[0]
    x = x_nchw[:, 0, :, :]                                   # (N, 16, 16), Cin=1

    out_pad = pl.pallas_call(
        _fused_forward_kernel,
        out_shape=jax.ShapeDtypeStruct((n, 1, HID), jnp.float32),
        grid=(n,),
        in_specs=[
            pl.BlockSpec((1, IMG, IMG), lambda b: (b, 0, 0)),     # x
            pl.BlockSpec((3, IMG, L1), lambda b: (0, 0, 0)),      # m1
            pl.BlockSpec((1, L1), lambda b: (0, 0)),              # b1row
            pl.BlockSpec((2, P1, H1), lambda b: (0, 0, 0)),       # rsel
            pl.BlockSpec((2, L1, LP), lambda b: (0, 0, 0)),       # ssel
            pl.BlockSpec((3, LP, L2), lambda b: (0, 0, 0)),       # m2
            pl.BlockSpec((1, L2), lambda b: (0, 0)),              # b2row
            pl.BlockSpec((H2, L2, HID), lambda b: (0, 0, 0)),     # fw1p
            pl.BlockSpec((1, HID), lambda b: (0, 0)),             # fb1
            pl.BlockSpec((1, HID), lambda b: (0, 0)),             # fw2row
            pl.BlockSpec((1, 1), lambda b: (0, 0)),               # fb2
        ],
        out_specs=pl.BlockSpec((1, 1, HID), lambda b: (b, 0, 0)),
        compiler_params=pltpu.CompilerParams(
            dimension_semantics=("parallel",)),
    )(x, packed["m1"], packed["b1row"], packed["rsel"], packed["ssel"],
      packed["m2"], packed["b2row"], packed["fw1p"], packed["fb1"],
      packed["fw2row"], packed["fb2"])

    return out_pad[:, 0, :1]                                  # (N, 1)


# -----------------------------------------------------------------------------
# Pure-JAX reference (mirrors the torch module) for a correctness sanity check.
# -----------------------------------------------------------------------------
def reference_forward(tp, x_nchw):
    dn = ("NCHW", "OIHW", "NCHW")
    y = jax.lax.conv_general_dilated(x_nchw, tp["conv1_w"], (1, 1), "VALID",
                                     dimension_numbers=dn)
    y = jax.nn.relu(y + tp["conv1_b"][None, :, None, None])
    y = jax.lax.reduce_window(y, -jnp.inf, jax.lax.max,
                              (1, 1, 2, 2), (1, 1, 2, 2), "VALID")
    y = jax.lax.conv_general_dilated(y, tp["conv2_w"], (1, 1), "VALID",
                                     dimension_numbers=dn)
    y = jax.nn.relu(y + tp["conv2_b"][None, :, None, None])
    flat = y.reshape(y.shape[0], -1)                          # NCHW flatten
    h = flat @ tp["fc1_w"] + tp["fc1_b"]
    z = h @ tp["fc2_w"] + tp["fc2_b"]
    return jax.nn.sigmoid(z)


if __name__ == "__main__":
    key = jax.random.PRNGKey(0)
    pkey, xkey = jax.random.split(key)

    torch_params = init_torch_like_params(pkey)
    packed = pack_params(torch_params)                        # one-time packing

    x = jax.random.normal(xkey, (2, 1, IMG, IMG), jnp.float32)   # NCHW like torch

    out = forward(packed, x)
    out = jax.block_until_ready(out)

    assert out.shape == (2, 1), out.shape
    assert bool(jnp.all(jnp.isfinite(out)))
    assert bool(jnp.all((out >= 0.0) & (out <= 1.0)))

    ref = reference_forward(torch_params, x)
    assert bool(jnp.all(jnp.abs(out - ref) < 2e-2)), (out, ref)

    print("KERNEL_OK")
</pallas_src>

<mosaic_0001>
module attributes {stable_mosaic.version = 11 : i64} {
  func.func @_fused_forward_kernel(%arg0: i32, %arg1: memref<1x16x16xf32, #tpu.memory_space<vmem>>, %arg2: memref<3x16x224xf32, #tpu.memory_space<vmem>>, %arg3: memref<1x224xf32, #tpu.memory_space<vmem>>, %arg4: memref<2x7x14xf32, #tpu.memory_space<vmem>>, %arg5: memref<2x224x112xf32, #tpu.memory_space<vmem>>, %arg6: memref<3x112x80xf32, #tpu.memory_space<vmem>>, %arg7: memref<1x80xf32, #tpu.memory_space<vmem>>, %arg8: memref<5x80x128xf32, #tpu.memory_space<vmem>>, %arg9: memref<1x128xf32, #tpu.memory_space<vmem>>, %arg10: memref<1x128xf32, #tpu.memory_space<vmem>>, %arg11: memref<1x1xf32, #tpu.memory_space<vmem>>, %arg12: memref<1x1x128xf32, #tpu.memory_space<vmem>>) attributes {dimension_semantics = [#tpu.dimension_semantics<parallel>], iteration_bounds = array<i64: 2>, scalar_prefetch = 0 : i64, scratch_operands = 0 : i64, tpu.core_type = #tpu.core_type<tc>, window_params = [{transform_indices = @transform_0, window_bounds = array<i64: 1, 16, 16>}, {pipeline_mode = #tpu.pipeline_mode<synchronous>, transform_indices = @transform_1, window_bounds = array<i64: 3, 16, 224>}, {pipeline_mode = #tpu.pipeline_mode<synchronous>, transform_indices = @transform_2, window_bounds = array<i64: 1, 224>}, {pipeline_mode = #tpu.pipeline_mode<synchronous>, transform_indices = @transform_3, window_bounds = array<i64: 2, 7, 14>}, {pipeline_mode = #tpu.pipeline_mode<synchronous>, transform_indices = @transform_4, window_bounds = array<i64: 2, 224, 112>}, {pipeline_mode = #tpu.pipeline_mode<synchronous>, transform_indices = @transform_5, window_bounds = array<i64: 3, 112, 80>}, {pipeline_mode = #tpu.pipeline_mode<synchronous>, transform_indices = @transform_6, window_bounds = array<i64: 1, 80>}, {pipeline_mode = #tpu.pipeline_mode<synchronous>, transform_indices = @transform_7, window_bounds = array<i64: 5, 80, 128>}, {pipeline_mode = #tpu.pipeline_mode<synchronous>, transform_indices = @transform_8, window_bounds = array<i64: 1, 128>}, {pipeline_mode = #tpu.pipeline_mode<synchronous>, transform_indices = @transform_9, window_bounds = array<i64: 1, 128>}, {pipeline_mode = #tpu.pipeline_mode<synchronous>, transform_indices = @transform_10, window_bounds = array<i64: 1, 1>}, {transform_indices = @transform_11, window_bounds = array<i64: 1, 1, 128>}]} {
    %c0 = arith.constant 0 : index
    %c0_0 = arith.constant 0 : index
    %c0_1 = arith.constant 0 : index
    %0 = vector.load %arg1[%c0, %c0_0, %c0_1] : memref<1x16x16xf32, #tpu.memory_space<vmem>>, vector<1x16x16xf32>
    %1 = vector.shape_cast %0 : vector<1x16x16xf32> to vector<16x16xf32>
    %2 = vector.extract_strided_slice %1 {offsets = [0, 0], sizes = [14, 16], strides = [1, 1]} : vector<16x16xf32> to vector<14x16xf32>
    %c0_2 = arith.constant 0 : index
    %c0_3 = arith.constant 0 : index
    %c0_4 = arith.constant 0 : index
    %3 = vector.load %arg2[%c0_2, %c0_3, %c0_4] : memref<3x16x224xf32, #tpu.memory_space<vmem>>, vector<1x16x224xf32>
    %4 = vector.shape_cast %3 : vector<1x16x224xf32> to vector<16x224xf32>
    %cst = arith.constant dense<0.000000e+00> : vector<14x224xf32>
    %5 = tpu.matmul %2, %4, %cst {dimension_numbers = #tpu.dot_dimension_numbers<[1], [0], [0], [1], [0, 0, 1, 1], [], []>} : vector<14x16xf32>, vector<16x224xf32>, vector<14x224xf32> -> vector<14x224xf32>
    %6 = vector.extract_strided_slice %1 {offsets = [1, 0], sizes = [14, 16], strides = [1, 1]} : vector<16x16xf32> to vector<14x16xf32>
    %c1 = arith.constant 1 : index
    %c0_5 = arith.constant 0 : index
    %c0_6 = arith.constant 0 : index
    %7 = vector.load %arg2[%c1, %c0_5, %c0_6] : memref<3x16x224xf32, #tpu.memory_space<vmem>>, vector<1x16x224xf32>
    %8 = vector.shape_cast %7 : vector<1x16x224xf32> to vector<16x224xf32>
    %cst_7 = arith.constant dense<0.000000e+00> : vector<14x224xf32>
    %9 = tpu.matmul %6, %8, %cst_7 {dimension_numbers = #tpu.dot_dimension_numbers<[1], [0], [0], [1], [0, 0, 1, 1], [], []>} : vector<14x16xf32>, vector<16x224xf32>, vector<14x224xf32> -> vector<14x224xf32>
    %10 = arith.addf %5, %9 : vector<14x224xf32>
    %11 = vector.extract_strided_slice %1 {offsets = [2, 0], sizes = [14, 16], strides = [1, 1]} : vector<16x16xf32> to vector<14x16xf32>
    %c2 = arith.constant 2 : index
    %c0_8 = arith.constant 0 : index
    %c0_9 = arith.constant 0 : index
    %12 = vector.load %arg2[%c2, %c0_8, %c0_9] : memref<3x16x224xf32, #tpu.memory_space<vmem>>, vector<1x16x224xf32>
    %13 = vector.shape_cast %12 : vector<1x16x224xf32> to vector<16x224xf32>
    %cst_10 = arith.constant dense<0.000000e+00> : vector<14x224xf32>
    %14 = tpu.matmul %11, %13, %cst_10 {dimension_numbers = #tpu.dot_dimension_numbers<[1], [0], [0], [1], [0, 0, 1, 1], [], []>} : vector<14x16xf32>, vector<16x224xf32>, vector<14x224xf32> -> vector<14x224xf32>
    %15 = arith.addf %10, %14 : vector<14x224xf32>
    %c0_11 = arith.constant 0 : index
    %c0_12 = arith.constant 0 : index
    %16 = vector.load %arg3[%c0_11, %c0_12] : memref<1x224xf32, #tpu.memory_space<vmem>>, vector<1x224xf32>
    %17 = vector.broadcast %16 : vector<1x224xf32> to vector<14x224xf32>
    %18 = arith.addf %15, %17 : vector<14x224xf32>
    %cst_13 = arith.constant 0.000000e+00 : f32
    %19 = vector.broadcast %cst_13 : f32 to vector<14x224xf32>
    %20 = arith.maximumf %18, %19 : vector<14x224xf32>
    %c0_14 = arith.constant 0 : index
    %c0_15 = arith.constant 0 : index
    %c0_16 = arith.constant 0 : index
    %21 = vector.load %arg4[%c0_14, %c0_15, %c0_16] : memref<2x7x14xf32, #tpu.memory_space<vmem>>, vector<1x7x14xf32>
    %22 = vector.shape_cast %21 : vector<1x7x14xf32> to vector<7x14xf32>
    %cst_17 = arith.constant dense<0.000000e+00> : vector<7x224xf32>
    %23 = tpu.matmul %22, %20, %cst_17 {dimension_numbers = #tpu.dot_dimension_numbers<[1], [0], [0], [1], [0, 0, 1, 1], [], []>} : vector<7x14xf32>, vector<14x224xf32>, vector<7x224xf32> -> vector<7x224xf32>
    %c1_18 = arith.constant 1 : index
    %c0_19 = arith.constant 0 : index
    %c0_20 = arith.constant 0 : index
    %24 = vector.load %arg4[%c1_18, %c0_19, %c0_20] : memref<2x7x14xf32, #tpu.memory_space<vmem>>, vector<1x7x14xf32>
    %25 = vector.shape_cast %24 : vector<1x7x14xf32> to vector<7x14xf32>
    %cst_21 = arith.constant dense<0.000000e+00> : vector<7x224xf32>
    %26 = tpu.matmul %25, %20, %cst_21 {dimension_numbers = #tpu.dot_dimension_numbers<[1], [0], [0], [1], [0, 0, 1, 1], [], []>} : vector<7x14xf32>, vector<14x224xf32>, vector<7x224xf32> -> vector<7x224xf32>
    %27 = arith.maximumf %23, %26 : vector<7x224xf32>
    %c0_22 = arith.constant 0 : index
    %c0_23 = arith.constant 0 : index
    %c0_24 = arith.constant 0 : index
    %28 = vector.load %arg5[%c0_22, %c0_23, %c0_24] : memref<2x224x112xf32, #tpu.memory_space<vmem>>, vector<1x224x112xf32>
    %29 = vector.shape_cast %28 : vector<1x224x112xf32> to vector<224x112xf32>
    %cst_25 = arith.constant dense<0.000000e+00> : vector<7x112xf32>
    %30 = tpu.matmul %27, %29, %cst_25 {dimension_numbers = #tpu.dot_dimension_numbers<[1], [0], [0], [1], [0, 0, 1, 1], [], []>} : vector<7x224xf32>, vector<224x112xf32>, vector<7x112xf32> -> vector<7x112xf32>
    %c1_26 = arith.constant 1 : index
    %c0_27 = arith.constant 0 : index
    %c0_28 = arith.constant 0 : index
    %31 = vector.load %arg5[%c1_26, %c0_27, %c0_28] : memref<2x224x112xf32, #tpu.memory_space<vmem>>, vector<1x224x112xf32>
    %32 = vector.shape_cast %31 : vector<1x224x112xf32> to vector<224x112xf32>
    %cst_29 = arith.constant dense<0.000000e+00> : vector<7x112xf32>
    %33 = tpu.matmul %27, %32, %cst_29 {dimension_numbers = #tpu.dot_dimension_numbers<[1], [0], [0], [1], [0, 0, 1, 1], [], []>} : vector<7x224xf32>, vector<224x112xf32>, vector<7x112xf32> -> vector<7x112xf32>
    %34 = arith.maximumf %30, %33 : vector<7x112xf32>
    %35 = vector.extract_strided_slice %34 {offsets = [0, 0], sizes = [5, 112], strides = [1, 1]} : vector<7x112xf32> to vector<5x112xf32>
    %c0_30 = arith.constant 0 : index
    %c0_31 = arith.constant 0 : index
    %c0_32 = arith.constant 0 : index
    %36 = vector.load %arg6[%c0_30, %c0_31, %c0_32] : memref<3x112x80xf32, #tpu.memory_space<vmem>>, vector<1x112x80xf32>
    %37 = vector.shape_cast %36 : vector<1x112x80xf32> to vector<112x80xf32>
    %cst_33 = arith.constant dense<0.000000e+00> : vector<5x80xf32>
    %38 = tpu.matmul %35, %37, %cst_33 {dimension_numbers = #tpu.dot_dimension_numbers<[1], [0], [0], [1], [0, 0, 1, 1], [], []>} : vector<5x112xf32>, vector<112x80xf32>, vector<5x80xf32> -> vector<5x80xf32>
    %39 = vector.extract_strided_slice %34 {offsets = [1, 0], sizes = [5, 112], strides = [1, 1]} : vector<7x112xf32> to vector<5x112xf32>
    %c1_34 = arith.constant 1 : index
    %c0_35 = arith.constant 0 : index
    %c0_36 = arith.constant 0 : index
    %40 = vector.load %arg6[%c1_34, %c0_35, %c0_36] : memref<3x112x80xf32, #tpu.memory_space<vmem>>, vector<1x112x80xf32>
    %41 = vector.shape_cast %40 : vector<1x112x80xf32> to vector<112x80xf32>
    %cst_37 = arith.constant dense<0.000000e+00> : vector<5x80xf32>
    %42 = tpu.matmul %39, %41, %cst_37 {dimension_numbers = #tpu.dot_dimension_numbers<[1], [0], [0], [1], [0, 0, 1, 1], [], []>} : vector<5x112xf32>, vector<112x80xf32>, vector<5x80xf32> -> vector<5x80xf32>
    %43 = arith.addf %38, %42 : vector<5x80xf32>
    %44 = vector.extract_strided_slice %34 {offsets = [2, 0], sizes = [5, 112], strides = [1, 1]} : vector<7x112xf32> to vector<5x112xf32>
    %c2_38 = arith.constant 2 : index
    %c0_39 = arith.constant 0 : index
    %c0_40 = arith.constant 0 : index
    %45 = vector.load %arg6[%c2_38, %c0_39, %c0_40] : memref<3x112x80xf32, #tpu.memory_space<vmem>>, vector<1x112x80xf32>
    %46 = vector.shape_cast %45 : vector<1x112x80xf32> to vector<112x80xf32>
    %cst_41 = arith.constant dense<0.000000e+00> : vector<5x80xf32>
    %47 = tpu.matmul %44, %46, %cst_41 {dimension_numbers = #tpu.dot_dimension_numbers<[1], [0], [0], [1], [0, 0, 1, 1], [], []>} : vector<5x112xf32>, vector<112x80xf32>, vector<5x80xf32> -> vector<5x80xf32>
    %48 = arith.addf %43, %47 : vector<5x80xf32>
    %c0_42 = arith.constant 0 : index
    %c0_43 = arith.constant 0 : index
    %49 = vector.load %arg7[%c0_42, %c0_43] : memref<1x80xf32, #tpu.memory_space<vmem>>, vector<1x80xf32>
    %50 = vector.broadcast %49 : vector<1x80xf32> to vector<5x80xf32>
    %51 = arith.addf %48, %50 : vector<5x80xf32>
    %cst_44 = arith.constant 0.000000e+00 : f32
    %52 = vector.broadcast %cst_44 : f32 to vector<5x80xf32>
    %53 = arith.maximumf %51, %52 : vector<5x80xf32>
    %c0_45 = arith.constant 0 : index
    %c0_46 = arith.constant 0 : index
    %54 = vector.load %arg9[%c0_45, %c0_46] : memref<1x128xf32, #tpu.memory_space<vmem>>, vector<1x128xf32>
    %55 = vector.extract_strided_slice %53 {offsets = [0, 0], sizes = [1, 80], strides = [1, 1]} : vector<5x80xf32> to vector<1x80xf32>
    %c0_47 = arith.constant 0 : index
    %c0_48 = arith.constant 0 : index
    %c0_49 = arith.constant 0 : index
    %56 = vector.load %arg8[%c0_47, %c0_48, %c0_49] : memref<5x80x128xf32, #tpu.memory_space<vmem>>, vector<1x80x128xf32>
    %57 = vector.shape_cast %56 : vector<1x80x128xf32> to vector<80x128xf32>
    %cst_50 = arith.constant dense<0.000000e+00> : vector<1x128xf32>
    %58 = tpu.matmul %55, %57, %cst_50 {dimension_numbers = #tpu.dot_dimension_numbers<[1], [0], [0], [1], [0, 0, 1, 1], [], []>} : vector<1x80xf32>, vector<80x128xf32>, vector<1x128xf32> -> vector<1x128xf32>
    %59 = arith.addf %54, %58 : vector<1x128xf32>
    %60 = vector.extract_strided_slice %53 {offsets = [1, 0], sizes = [1, 80], strides = [1, 1]} : vector<5x80xf32> to vector<1x80xf32>
    %c1_51 = arith.constant 1 : index
    %c0_52 = arith.constant 0 : index
    %c0_53 = arith.constant 0 : index
    %61 = vector.load %arg8[%c1_51, %c0_52, %c0_53] : memref<5x80x128xf32, #tpu.memory_space<vmem>>, vector<1x80x128xf32>
    %62 = vector.shape_cast %61 : vector<1x80x128xf32> to vector<80x128xf32>
    %cst_54 = arith.constant dense<0.000000e+00> : vector<1x128xf32>
    %63 = tpu.matmul %60, %62, %cst_54 {dimension_numbers = #tpu.dot_dimension_numbers<[1], [0], [0], [1], [0, 0, 1, 1], [], []>} : vector<1x80xf32>, vector<80x128xf32>, vector<1x128xf32> -> vector<1x128xf32>
    %64 = arith.addf %59, %63 : vector<1x128xf32>
    %65 = vector.extract_strided_slice %53 {offsets = [2, 0], sizes = [1, 80], strides = [1, 1]} : vector<5x80xf32> to vector<1x80xf32>
    %c2_55 = arith.constant 2 : index
    %c0_56 = arith.constant 0 : index
    %c0_57 = arith.constant 0 : index
    %66 = vector.load %arg8[%c2_55, %c0_56, %c0_57] : memref<5x80x128xf32, #tpu.memory_space<vmem>>, vector<1x80x128xf32>
    %67 = vector.shape_cast %66 : vector<1x80x128xf32> to vector<80x128xf32>
    %cst_58 = arith.constant dense<0.000000e+00> : vector<1x128xf32>
    %68 = tpu.matmul %65, %67, %cst_58 {dimension_numbers = #tpu.dot_dimension_numbers<[1], [0], [0], [1], [0, 0, 1, 1], [], []>} : vector<1x80xf32>, vector<80x128xf32>, vector<1x128xf32> -> vector<1x128xf32>
    %69 = arith.addf %64, %68 : vector<1x128xf32>
    %70 = vector.extract_strided_slice %53 {offsets = [3, 0], sizes = [1, 80], strides = [1, 1]} : vector<5x80xf32> to vector<1x80xf32>
    %c3 = arith.constant 3 : index
    %c0_59 = arith.constant 0 : index
    %c0_60 = arith.constant 0 : index
    %71 = vector.load %arg8[%c3, %c0_59, %c0_60] : memref<5x80x128xf32, #tpu.memory_space<vmem>>, vector<1x80x128xf32>
    %72 = vector.shape_cast %71 : vector<1x80x128xf32> to vector<80x128xf32>
    %cst_61 = arith.constant dense<0.000000e+00> : vector<1x128xf32>
    %73 = tpu.matmul %70, %72, %cst_61 {dimension_numbers = #tpu.dot_dimension_numbers<[1], [0], [0], [1], [0, 0, 1, 1], [], []>} : vector<1x80xf32>, vector<80x128xf32>, vector<1x128xf32> -> vector<1x128xf32>
    %74 = arith.addf %69, %73 : vector<1x128xf32>
    %75 = vector.extract_strided_slice %53 {offsets = [4, 0], sizes = [1, 80], strides = [1, 1]} : vector<5x80xf32> to vector<1x80xf32>
    %c4 = arith.constant 4 : index
    %c0_62 = arith.constant 0 : index
    %c0_63 = arith.constant 0 : index
    %76 = vector.load %arg8[%c4, %c0_62, %c0_63] : memref<5x80x128xf32, #tpu.memory_space<vmem>>, vector<1x80x128xf32>
    %77 = vector.shape_cast %76 : vector<1x80x128xf32> to vector<80x128xf32>
    %cst_64 = arith.constant dense<0.000000e+00> : vector<1x128xf32>
    %78 = tpu.matmul %75, %77, %cst_64 {dimension_numbers = #tpu.dot_dimension_numbers<[1], [0], [0], [1], [0, 0, 1, 1], [], []>} : vector<1x80xf32>, vector<80x128xf32>, vector<1x128xf32> -> vector<1x128xf32>
    %79 = arith.addf %74, %78 : vector<1x128xf32>
    %c0_65 = arith.constant 0 : index
    %c0_66 = arith.constant 0 : index
    %80 = vector.load %arg10[%c0_65, %c0_66] : memref<1x128xf32, #tpu.memory_space<vmem>>, vector<1x128xf32>
    %81 = arith.mulf %79, %80 : vector<1x128xf32>
    %cst_67 = arith.constant dense<0.000000e+00> : vector<1xf32>
    %82 = vector.multi_reduction <add>, %81, %cst_67 [1] : vector<1x128xf32> to vector<1xf32>
    %83 = vector.shape_cast %82 : vector<1xf32> to vector<1x1xf32>
    %c0_68 = arith.constant 0 : index
    %c0_69 = arith.constant 0 : index
    %84 = vector.load %arg11[%c0_68, %c0_69] : memref<1x1xf32, #tpu.memory_space<vmem>>, vector<1x1xf32>
    %85 = arith.addf %83, %84 : vector<1x1xf32>
    %86 = math.absf %85 : vector<1x1xf32>
    %cst_70 = arith.constant 0.000000e+00 : f32
    %87 = vector.broadcast %cst_70 : f32 to vector<1x1xf32>
    %88 = arith.subf %87, %86 : vector<1x1xf32>
    %89 = math.exp %88 : vector<1x1xf32>
    %cst_71 = arith.constant 1.000000e+00 : f32
    %90 = vector.broadcast %cst_71 : f32 to vector<1x1xf32>
    %91 = arith.addf %90, %89 : vector<1x1xf32>
    %cst_72 = arith.constant 1.000000e+00 : f32
    %92 = vector.broadcast %cst_72 : f32 to vector<1x1xf32>
    %93 = arith.divf %92, %91 : vector<1x1xf32>
    %cst_73 = arith.constant 0.000000e+00 : f32
    %94 = vector.broadcast %cst_73 : f32 to vector<1x1xf32>
    %95 = arith.cmpf oge, %85, %94 : vector<1x1xf32>
    %cst_74 = arith.constant 1.000000e+00 : f32
    %96 = vector.broadcast %cst_74 : f32 to vector<1x1xf32>
    %97 = arith.subf %96, %93 : vector<1x1xf32>
    %98 = arith.select %95, %93, %97 : vector<1x1xi1>, vector<1x1xf32>
    %99 = vector.shape_cast %98 : vector<1x1xf32> to vector<1x1x1xf32>
    %100 = vector.broadcast %99 : vector<1x1x1xf32> to vector<1x1x128xf32>
    %c0_75 = arith.constant 0 : index
    %c0_76 = arith.constant 0 : index
    %c0_77 = arith.constant 0 : index
    %101 = vector.load %arg12[%c0_75, %c0_76, %c0_77] : memref<1x1x128xf32, #tpu.memory_space<vmem>>, vector<1x1x128xf32>
    tpu.vector_store %arg12[%c0_75, %c0_76, %c0_77], %100 {strides = array<i32>} : memref<1x1x128xf32, #tpu.memory_space<vmem>>, vector<1x1x128xf32>,
    return
  }
  func.func @transform_0(%arg0: i32) -> (i32, i32, i32) {
    %c0_i32 = arith.constant 0 : i32
    %c0_i32_0 = arith.constant 0 : i32
    %c0_i32_1 = arith.constant 0 : i32
    return %arg0, %c0_i32, %c0_i32_0 : i32, i32, i32
  }
  func.func @transform_1(%arg0: i32) -> (i32, i32, i32) {
    %c0_i32 = arith.constant 0 : i32
    %c0_i32_0 = arith.constant 0 : i32
    %c0_i32_1 = arith.constant 0 : i32
    %c0_i32_2 = arith.constant 0 : i32
    return %c0_i32, %c0_i32_0, %c0_i32_1 : i32, i32, i32
  }
  func.func @transform_2(%arg0: i32) -> (i32, i32) {
    %c0_i32 = arith.constant 0 : i32
    %c0_i32_0 = arith.constant 0 : i32
    %c0_i32_1 = arith.constant 0 : i32
    return %c0_i32, %c0_i32_0 : i32, i32
  }
  func.func @transform_3(%arg0: i32) -> (i32, i32, i32) {
    %c0_i32 = arith.constant 0 : i32
    %c0_i32_0 = arith.constant 0 : i32
    %c0_i32_1 = arith.constant 0 : i32
    %c0_i32_2 = arith.constant 0 : i32
    return %c0_i32, %c0_i32_0, %c0_i32_1 : i32, i32, i32
  }
  func.func @transform_4(%arg0: i32) -> (i32, i32, i32) {
    %c0_i32 = arith.constant 0 : i32
    %c0_i32_0 = arith.constant 0 : i32
    %c0_i32_1 = arith.constant 0 : i32
    %c0_i32_2 = arith.constant 0 : i32
    return %c0_i32, %c0_i32_0, %c0_i32_1 : i32, i32, i32
  }
  func.func @transform_5(%arg0: i32) -> (i32, i32, i32) {
    %c0_i32 = arith.constant 0 : i32
    %c0_i32_0 = arith.constant 0 : i32
    %c0_i32_1 = arith.constant 0 : i32
    %c0_i32_2 = arith.constant 0 : i32
    return %c0_i32, %c0_i32_0, %c0_i32_1 : i32, i32, i32
  }
  func.func @transform_6(%arg0: i32) -> (i32, i32) {
    %c0_i32 = arith.constant 0 : i32
    %c0_i32_0 = arith.constant 0 : i32
    %c0_i32_1 = arith.constant 0 : i32
    return %c0_i32, %c0_i32_0 : i32, i32
  }
  func.func @transform_7(%arg0: i32) -> (i32, i32, i32) {
    %c0_i32 = arith.constant 0 : i32
    %c0_i32_0 = arith.constant 0 : i32
    %c0_i32_1 = arith.constant 0 : i32
    %c0_i32_2 = arith.constant 0 : i32
    return %c0_i32, %c0_i32_0, %c0_i32_1 : i32, i32, i32
  }
  func.func @transform_8(%arg0: i32) -> (i32, i32) {
    %c0_i32 = arith.constant 0 : i32
    %c0_i32_0 = arith.constant 0 : i32
    %c0_i32_1 = arith.constant 0 : i32
    return %c0_i32, %c0_i32_0 : i32, i32
  }
  func.func @transform_9(%arg0: i32) -> (i32, i32) {
    %c0_i32 = arith.constant 0 : i32
    %c0_i32_0 = arith.constant 0 : i32
    %c0_i32_1 = arith.constant 0 : i32
    return %c0_i32, %c0_i32_0 : i32, i32
  }
  func.func @transform_10(%arg0: i32) -> (i32, i32) {
    %c0_i32 = arith.constant 0 : i32
    %c0_i32_0 = arith.constant 0 : i32
    %c0_i32_1 = arith.constant 0 : i32
    return %c0_i32, %c0_i32_0 : i32, i32
  }
  func.func @transform_11(%arg0: i32) -> (i32, i32, i32) {
    %c0_i32 = arith.constant 0 : i32
    %c0_i32_0 = arith.constant 0 : i32
    %c0_i32_1 = arith.constant 0 : i32
    return %arg0, %c0_i32, %c0_i32_0 : i32, i32, i32
  }
}

</mosaic_0001>

<bundles_post_ra>
// kernel: forward.1
= control target key start
LH: loop header
LB: loop body
LE: loop exit
PB: predicated region body
PF: predicated region fallthrough
CT: control target
= control target key end

     0   :  { %s3185_s0 = inlined_call_operand.vmem [shape: f32[2,16,16], index: 0, kind: input, shape index: {}]   ;;  %s3186_s1 = inlined_call_operand.vmem [shape: f32[3,16,224], index: 1, kind: input, shape index: {}]   ;;  %s3187_s2 = inlined_call_operand.vmem [shape: f32[1,224], index: 2, kind: input, shape index: {}]   ;;  %s3188_s3 = inlined_call_operand.vmem [shape: f32[2,7,14], index: 3, kind: input, shape index: {}]   ;;  %s3189_s4 = inlined_call_operand.vmem [shape: f32[2,224,112], index: 4, kind: input, shape index: {}]   ;;  %s3190_s5 = inlined_call_operand.vmem [shape: f32[3,112,80], index: 5, kind: input, shape index: {}]   ;;  %s3191_s6 = inlined_call_operand.vmem [shape: f32[1,80], index: 6, kind: input, shape index: {}]   ;;  %s3192_s7 = inlined_call_operand.hbm [shape: f32[5,80,128], index: 7, kind: input, shape index: {}]   ;;  %s3193_s8 = inlined_call_operand.vmem [shape: f32[1,128], index: 8, kind: input, shape index: {}]   ;;  %s3194_s9 = inlined_call_operand.vmem [shape: f32[1,128], index: 9, kind: input, shape index: {}]   ;;  %s3195_s10 = inlined_call_operand.<no memory space> [shape: f32[1,1], index: 10, kind: input, shape index: {}]   ;;  %s3196_s11 = inlined_call_operand.vmem [shape: f32[2,1,128], index: 11, kind: output, shape index: {}]  }
   0x1   :  { %v16_v0 = vstv %s3195_s10 }
   0x2   :  { %17 = vst [vmem:[#allocation2] sm:$0x1] %v16_v0 }
   0x3   :  { %18 = vsyncpa [#allocation4], 0  ;;  %s2652_s19 = smov 0  }
   0x4 LB: > { %s2658_s20 = sadd.s32 4294967295, %s2579_s19   ;;  %p1841_p0 = scmp.ge.s32.totalorder %s2579_s19, 1  ;;  %s2579_s19 = sphi %s2652_s19, %s24_s19  }
   0x5   : > { %p291_p1 = scmp.lt.s32.totalorder %s2579_s19, 3  ;;  %s2581_s21 = smov [#allocation3]  }
   0x6   : > { %s321_s10 = sshll.u32 %s2581_s21, 4  ;;  %p3197_p3 = scmp.eq.s32.totalorder %s2658_s20, 0  ;;  %s322_s10 = int_to_ptr.vmem [resolvable:$true] %s321_s10 }
   0x7   : > { %p2662_p2 = pnand %p1841_p0, %p291_p1  ;;  %s2541_s26 = scalar_lea.hbm %s3192_s7, 6400 }
   0x8   : > { %p2542_p6 = scmp.ne.s32.totalorder %s3192_s7, %s2541_s26  ;;  %p2548_p10 = scmp.lt.u32.totalorder %s2541_s26, %s3192_s7 }
   0x9   : > { %s3199_s22 = scalar_select %p2662_p2, 1, 0 }
   0xa   : > { %p2514_p4 = pneg %p2662_p2 }
   0xc   : > { %p2671_p5 = pnand %p3197_p3, %p2514_p4 }
   0xe   : > { %p2543_p7 = pneg %p2671_p5 }
  0x10   : > { %p2544_p8 = pnand %p2543_p7, %p2542_p6 }
  0x12   : > { %p2545_p9 = pneg %p2544_p8 }
  0x14   : > { %p2550_p11 = pnand %p2548_p10, %p2545_p9 }
  0x16   : > { %2553 = shalt.err (!%p2550_p11)
}
  0x17   : > { %s2554_s12 = scalar_lea.vmem %s322_s10, 6400  ;;  %p2562_p1 = scmp.lt.s32.totalorder %s322_s10, %s322_s10 }
  0x18   : > { %p2555_p12 = scmp.ne.s32.totalorder %s322_s10, %s2554_s12  ;;  %p2563_p4 = scmp.lt.s32.totalorder %s2554_s12, %s2554_s12 }
  0x1a   : > { %p2557_p13 = pnand %p2555_p12, %p2543_p7  ;;  %p2564_p3 = por %p2563_p4, %p2562_p1 }
  0x1c   : > { %p2558_p0 = pneg %p2557_p13 }
  0x1e   : > { %p2565_p2 = pnand %p2564_p3, %p2558_p0 }
  0x20   : > { %2568 = shalt.err (!%p2565_p2)
}
  0x21   : > { %s2582_s13 = smov 128   ;;  %s2583_s14 = smov 8  }
  0x22   : > { %2517 = dma.hbm_to_vmem [thread:$0]  (!%p2671_p5), %s3192_s7, 6400, %s322_s10, [#allocation4], %s2582_s13, %s2582_s13, %s2583_s14  }
  0x23   : > { %p3201_p6 = scmp.ne.s32.totalorder %s3199_s22, 0 }
  0x24   : > { %p3202_p8 = scmp.eq.s32.totalorder (!%p3201_p6), %s2658_s20, 0 }
  0x25   : > { %354 = sbr.rel (%p3201_p6) target bundleno = 1638 (0x666), region = 64 }
  0x2c   : > { %2574 = dma.done.wait (%p3202_p8), [#allocation4], 6400   ;;  %p3203_p7 = pmov %p3202_p8 }
  0x2d   : > { %p392_p2 = scmp.lt.s32.totalorder %s2658_s20, 1  ;;  %v2584_v1 = vmov 0.0   ;;  %v1849_v2 = vld [vmem:[%s3186_s1 + $0x28] sm:$0xff]  ;;  %v1851_v3 = vld [vmem:[%s3186_s1 + $0x38] sm:$0xff]  ;;  %v1848_v4 = vld [vmem:[%s3186_s1 + $0x20] sm:$0xff]  ;;  %vm413_vm0 = vcmask 1046528  }
  0x2e   : > { %2576 = vsyncadd (%p3203_p7), [#allocation4], 4294960896  ;;  %486 = vmatprep.mubr.f32.mxu0 %v2584_v1  ;;  %v2247_v5 = vpack.c.bf16 %v1851_v3, %v1849_v2  ;;  %v1850_v6 = vld [vmem:[%s3186_s1 + $0x30] sm:$0xff]  ;;  %v403_v12 = vld [vmem:[%s3186_s1 + $0x8] sm:$0xff]  ;;  %vm417_vm1 = vcmask 130048   ;;  %vm585_vm2 = vcmask 1045504  }
  0x2f   : > { %s3205_s20 = smov (!%p392_p2, %s2658_s20), 1  ;;  %v2249_v9 = vpack.c.bf16 %v1850_v6, %v1848_v4  ;;  %v405_v13 = vld [vmem:[%s3186_s1 + $0x18] sm:$0xff]  ;;  %v402_v14 = vld [vmem:[%s3186_s1] sm:$0xff]  ;;  %v404_v16 = vld [vmem:[%s3186_s1 + $0x10] sm:$0xff]  ;;  %v2585_v31 = vmov 0.0|0.0   ;;  %vm2586_vm3 = vmmov 1  }
  0x30   : > { %s1938_s17 = sshll.u32 %s3205_s20, 4  ;;  %2248 = vmatprep.subr.bf16.mxu0 %v2247_v5  ;;  %v2251_v15 = vpack.c.bf16 %v405_v13, %v403_v12  ;;  %v1857_v17 = vld [vmem:[%s3186_s1 + $0x48] sm:$0xff]  ;;  %v1859_v18 = vld [vmem:[%s3186_s1 + $0x58] sm:$0xff]  ;;  %v2253_v20 = vpack.c.bf16 %v404_v16, %v402_v14  ;;  %v1856_v22 = vld [vmem:[%s3186_s1 + $0x40] sm:$0xff]  ;;  %2271 = vmatprep.subr.bf16.mxu1 %v2585_v31  ;;  %v676_v5 = vlaneseq  ;;  %vm695_vm5 = vcmask 113664   ;;  %s399_s22 = scalar_lea.vmem %s3196_s11, %s3205_s20 }
  0x31   : > { %s396_s10 = scalar_lea.vmem %s3185_s0, %s1938_s17  ;;  %2250 = vmatpush1.bf16.msra.mxu0 %v2249_v9  ;;  %v2255_v21 = vpack.c.bf16 %v1859_v18, %v1857_v17  ;;  %v1858_v23 = vld [vmem:[%s3186_s1 + $0x50] sm:$0xff]  ;;  %v854_v28 = vld [vmem:[%s3189_s4] sm:$0xff]  ;;  %v855_v29 = vld [vmem:[%s3189_s4 + $0x8] sm:$0xff]  ;;  %vm882_vm6 = vcmask 785408   ;;  %vm2587_vm7 = vmmov 0   ;;  %vm1087_vm8 = vcmask 916480  }
  0x32   : > { %v400_v7 = vld [vmem:[%s396_s10] sm:$0xff]  ;;  %v401_v8 = vld [vmem:[%s396_s10 + $0x8] sm:$0xff]  ;;  %2252 = vmatprep.subr.bf16.mxu0 %v2251_v15  ;;  %v2257_v24 = vpack.c.bf16 %v1858_v23, %v1856_v22  ;;  %v856_v30 = vld [vmem:[%s3189_s4 + $0x10] sm:$0xff]  ;;  %v2272_v32 = vpack.c.bf16 %v855_v29, %v854_v28  ;;  %v677_v6 = vshrl.u32 %v676_v5, 7  ;;  %vm1341_vm9 = vcmask 654336  }
  0x33   : > { %v414_v10 = vrot.slane %v400_v7, 1  ;;  %v415_v11 = vrot.slane %v401_v8, 1  ;;  %v586_v25 = vrot.slane %v400_v7, 2  ;;  %v587_v26 = vrot.slane %v401_v8, 2  ;;  %v857_v33 = vld [vmem:[%s3189_s4 + $0x18] sm:$0xff]  ;;  %v858_v35 = vld [vmem:[%s3189_s4 + $0x20] sm:$0xff]  ;;  %vm2260_vm4 = vmpackc.low %vm585_vm2, %vm2586_vm3 }
  0x34   : > { %2273 = vmatpush1.bf16.msra.mxu1 %v2272_v32  ;;  %v2275_v34 = vpack.c.bf16 %v857_v33, %v856_v30  ;;  %v859_v36 = vld [vmem:[%s3189_s4 + $0x28] sm:$0xff]  ;;  %v860_v38 = vld [vmem:[%s3189_s4 + $0x30] sm:$0xff]  ;;  %v861_v39 = vld [vmem:[%s3189_s4 + $0x38] sm:$0xff]  ;;  %v682_v9 = vsub.s32 1, %v677_v6  ;;  %vm1758_vm10 = vcmask 1040384  }
  0x35   : > { %v416_v19 = vsel %vm413_vm0, %v414_v10, %v415_v11  ;;  %v588_v27 = vsel %vm585_vm2, %v586_v25, %v587_v26  ;;  %2274 = vmatprep.subr.bf16.mxu1 %v2585_v31  ;;  %v2278_v37 = vpack.c.bf16 %v859_v36, %v858_v35  ;;  %v2281_v40 = vpack.c.bf16 %v861_v39, %v860_v38  ;;  %v862_v41 = vld [vmem:[%s3189_s4 + $0x40] sm:$0xff]  ;;  %v863_v42 = vld [vmem:[%s3189_s4 + $0x48] sm:$0xff]  ;;  %v864_v44 = vld [vmem:[%s3189_s4 + $0x50] sm:$0xff] }
  0x36   : > { %1852 = vmatmul.mubr.msk.f32.vlgmr.msra.gmra.mrb[0].mxu0 %vm417_vm1, %v416_v19  ;;  %v2284_v43 = vpack.c.bf16 %v863_v42, %v862_v41  ;;  %v865_v45 = vld [vmem:[%s3189_s4 + $0x58] sm:$0xff]  ;;  %v866_v47 = vld [vmem:[%s3189_s4 + $0x60] sm:$0xff]  ;;  %v867_v48 = vld [vmem:[%s3189_s4 + $0x68] sm:$0xff] }
  0x37   : > { %492 = vmatprep.mubr.f32.mxu0 %v2584_v1  ;;  %2254 = vmatpush1.bf16.msra.mxu0 %v2253_v20  ;;  %v2287_v46 = vpack.c.bf16 %v865_v45, %v864_v44  ;;  %v2290_v49 = vpack.c.bf16 %v867_v48, %v866_v47  ;;  %v868_v50 = vld [vmem:[%s3189_s4 + $0x70] sm:$0xff]  ;;  %v869_v51 = vld [vmem:[%s3189_s4 + $0x78] sm:$0xff]  ;;  %v870_v53 = vld [vmem:[%s3189_s4 + $0x80] sm:$0xff] }
  0x38   : > { %2256 = vmatprep.subr.bf16.mxu0 %v2255_v21  ;;  %2276 = vmatpush1.bf16.msra.mxu1 %v2275_v34  ;;  %v2293_v52 = vpack.c.bf16 %v869_v51, %v868_v50  ;;  %v871_v54 = vld [vmem:[%s3189_s4 + $0x88] sm:$0xff]  ;;  %v872_v56 = vld [vmem:[%s3189_s4 + $0x90] sm:$0xff]  ;;  %v873_v57 = vld [vmem:[%s3189_s4 + $0x98] sm:$0xff] }
  0x39   : > { %2277 = vmatprep.subr.bf16.mxu1 %v2585_v31  ;;  %v2296_v55 = vpack.c.bf16 %v871_v54, %v870_v53  ;;  %v2299_v58 = vpack.c.bf16 %v873_v57, %v872_v56  ;;  %v874_v59 = vld [vmem:[%s3189_s4 + $0xa0] sm:$0xff]  ;;  %v875_v60 = vld [vmem:[%s3189_s4 + $0xa8] sm:$0xff]  ;;  %v876_v62 = vld [vmem:[%s3189_s4 + $0xb0] sm:$0xff] }
  0x3a   : > { %1853 = vmatmul.mubr.msk.f32.gmra.mrb[2].mxu0 %vm417_vm1, %v415_v11  ;;  %v2302_v61 = vpack.c.bf16 %v875_v60, %v874_v59  ;;  %v877_v63 = vld [vmem:[%s3189_s4 + $0xb8] sm:$0xff]  ;;  %v878_v2 = vld [vmem:[%s3189_s4 + $0xc0] sm:$0xff]  ;;  %v879_v3 = vld [vmem:[%s3189_s4 + $0xc8] sm:$0xff] }
  0x3b   : > { %567 = vmatprep.mubr.f32.mxu0 %v2584_v1  ;;  %v2305_v0 = vpack.c.bf16 %v877_v63, %v876_v62  ;;  %v2308_v4 = vpack.c.bf16 %v879_v3, %v878_v2  ;;  %v880_v28 = vld [vmem:[%s3189_s4 + $0xd0] sm:$0xff]  ;;  %v881_v29 = vld [vmem:[%s3189_s4 + $0xd8] sm:$0xff]  ;;  %v1870_v34 = vld [vmem:[%s3189_s4 + $0xe0] sm:$0xff] }
  0x3c   : > { %2279 = vmatpush1.bf16.msra.mxu1 %v2278_v37  ;;  %v2311_v30 = vpack.c.bf16 %v881_v29, %v880_v28  ;;  %v1871_v35 = vld [vmem:[%s3189_s4 + $0xe8] sm:$0xff]  ;;  %v1872_v41 = vld [vmem:[%s3189_s4 + $0xf0] sm:$0xff]  ;;  %v1873_v42 = vld [vmem:[%s3189_s4 + $0xf8] sm:$0xff] }
  0x3d   : > { %2280 = vmatprep.subr.bf16.mxu1 %v2585_v31  ;;  %v1874_v44 = vld [vmem:[%s3189_s4 + $0x100] sm:$0xff]  ;;  %v1875_v45 = vld [vmem:[%s3189_s4 + $0x108] sm:$0xff]  ;;  %v1876_v47 = vld [vmem:[%s3189_s4 + $0x110] sm:$0xff] }
  0x3e   : > { %1854 = vmatmul.mubr.msk.f32.vlgmr.msra.gmra.mrb[0].mxu0 %vm417_vm1, %v400_v7  ;;  %v678_v7 = vsub.s32 0, %v677_v6  ;;  %v1877_v48 = vld [vmem:[%s3189_s4 + $0x118] sm:$0xff]  ;;  %v1878_v50 = vld [vmem:[%s3189_s4 + $0x120] sm:$0xff]  ;;  %v1879_v51 = vld [vmem:[%s3189_s4 + $0x128] sm:$0xff] }
  0x3f   : > { %573 = vmatprep.mubr.f32.mxu0 %v2584_v1  ;;  %2258 = vmatpush1.bf16.msra.mxu0 %v2257_v24  ;;  %v1880_v53 = vld [vmem:[%s3189_s4 + $0x130] sm:$0xff]  ;;  %v1881_v54 = vld [vmem:[%s3189_s4 + $0x138] sm:$0xff]  ;;  %v1882_v56 = vld [vmem:[%s3189_s4 + $0x140] sm:$0xff] }
  0x40   : > { %2282 = vmatpush1.bf16.msra.mxu1 %v2281_v40  ;;  %v2314_v40 = vpack.c.bf16 %v1871_v35, %v1870_v34  ;;  %v1883_v57 = vld [vmem:[%s3189_s4 + $0x148] sm:$0xff]  ;;  %v1884_v59 = vld [vmem:[%s3189_s4 + $0x150] sm:$0xff]  ;;  %v1885_v60 = vld [vmem:[%s3189_s4 + $0x158] sm:$0xff] }
  0x41   : > { %2283 = vmatprep.subr.bf16.mxu1 %v2585_v31  ;;  %v1886_v62 = vld [vmem:[%s3189_s4 + $0x160] sm:$0xff]  ;;  %v1887_v63 = vld [vmem:[%s3189_s4 + $0x168] sm:$0xff]  ;;  %v1888_v2 = vld [vmem:[%s3189_s4 + $0x170] sm:$0xff] }
  0x42   : > { %1855 = vmatmul.mubr.msk.f32.gmra.mrb[2].mxu0 %vm417_vm1, %v401_v8  ;;  %v674_v8 = vld [vmem:[%s3187_s2] sm:$0x3]  ;;  %v1889_v3 = vld [vmem:[%s3189_s4 + $0x178] sm:$0xff]  ;;  %v1891_v6 = vld [vmem:[%s3189_s4 + $0x188] sm:$0xff] }
  0x43   : > { %657 = vmatprep.mubr.f32.mxu0 %v2584_v1  ;;  %v679_v10 = vrot.slane %v674_v8, %v678_v7  ;;  %v683_v12 = vrot.slane %v674_v8, %v682_v9  ;;  %v1890_v5 = vld [vmem:[%s3189_s4 + $0x180] sm:$0xff]  ;;  %v1892_v8 = vld [vmem:[%s3189_s4 + $0x190] sm:$0xff]  ;;  %v1893_v9 = vld [vmem:[%s3189_s4 + $0x198] sm:$0xff] }
  0x44   : > { %2285 = vmatpush1.bf16.msra.mxu1 %v2284_v43  ;;  %v2317_v43 = vpack.c.bf16 %v1873_v42, %v1872_v41  ;;  %v2344_v7 = vpack.c.bf16 %v1891_v6, %v1890_v5  ;;  %v1060_v29 = vld [vmem:[%s3190_s5 + $0x20] sm:$0xff]  ;;  %v1917_v6 = vld [vmem:[%s3190_s5 + $0xf0] sm:$0xff] }
  0x45   : > { %2286 = vmatprep.subr.bf16.mxu1 %v2585_v31  ;;  %v1064_v42 = vld [vmem:[%s3190_s5 + $0x40] sm:$0xff] }
  0x46   : > { %1860 = vmatmul.mubr.msk.f32.vlgmr.msra.gmra.mrb[0].mxu0 %vm417_vm1, %v588_v27  ;;  %v1865_v27 = vld [vmem:[%s3188_s3 + $0x8] sm:$0x7f] }
  0x47   : > { %663 = vmatprep.mubr.f32.mxu0 %v2584_v1 }
  0x48   : > { %2288 = vmatpush1.bf16.msra.mxu1 %v2287_v46  ;;  %v2320_v46 = vpack.c.bf16 %v1875_v45, %v1874_v44  ;;  %v1907_v44 = vld [vmem:[%s3190_s5 + $0xb0] sm:$0xff]  ;;  %v1908_v45 = vld [vmem:[%s3190_s5 + $0xb8] sm:$0xff] }
  0x49   : > { %2289 = vmatprep.subr.bf16.mxu1 %v2585_v31 }
  0x4a   : > { %1861 = vmatmul.mubr.msk.f32.gmra.mrb[2].mxu0 %vm417_vm1, %v587_v26  ;;  %v694_v26 = vld [vmem:[%s3188_s3] sm:$0x7f] }
  0x4b   : > { %769 = vmatprep.mubr.f32.mxu0 %v2584_v1 }
  0x4c   : > { %2291 = vmatpush1.bf16.msra.mxu1 %v2290_v49  ;;  %v2323_v49 = vpack.c.bf16 %v1877_v48, %v1876_v47  ;;  %v2368_v47 = vpack.c.bf16 %v1908_v45, %v1907_v44  ;;  %v1066_v48 = vld [vmem:[%s3190_s5 + $0x50] sm:$0xff] }
  0x4d   : > { %2292 = vmatprep.subr.bf16.mxu1 %v2585_v31 }
  0x50   : > { %2294 = vmatpush1.bf16.msra.mxu1 %v2293_v52  ;;  %v2326_v52 = vpack.c.bf16 %v1879_v51, %v1878_v50  ;;  %v1909_v50 = vld [vmem:[%s3190_s5 + $0xc0] sm:$0xff]  ;;  %v1910_v51 = vld [vmem:[%s3190_s5 + $0xc8] sm:$0xff] }
  0x51   : > { %2295 = vmatprep.subr.bf16.mxu1 %v2585_v31 }
  0x54   : > { %2297 = vmatpush1.bf16.msra.mxu1 %v2296_v55  ;;  %v2329_v55 = vpack.c.bf16 %v1881_v54, %v1880_v53  ;;  %v2371_v53 = vpack.c.bf16 %v1910_v51, %v1909_v50  ;;  %v1068_v54 = vld [vmem:[%s3190_s5 + $0x60] sm:$0xff]  ;;  %v1417_v50 = vld [vmem:[#allocation3 + $0x50] sm:$0xff] }
  0x55   : > { %2298 = vmatprep.subr.bf16.mxu1 %v2585_v31  ;;  %v1418_v51 = vld [vmem:[#allocation3 + $0x58] sm:$0xff] }
  0x58   : > { %2300 = vmatpush1.bf16.msra.mxu1 %v2299_v58  ;;  %v2332_v58 = vpack.c.bf16 %v1883_v57, %v1882_v56  ;;  %v1911_v57 = vld [vmem:[%s3190_s5 + $0xd0] sm:$0xff] }
  0x59   : > { %2301 = vmatprep.subr.bf16.mxu1 %v2585_v31 }
  0x5c   : > { %2303 = vmatpush1.bf16.msra.mxu1 %v2302_v61  ;;  %v2335_v61 = vpack.c.bf16 %v1885_v60, %v1884_v59 }
  0x5d   : > { %2304 = vmatprep.subr.bf16.mxu1 %v2585_v31 }
  0x60   : > { %2306 = vmatpush1.bf16.msra.mxu1 %v2305_v0  ;;  %v2338_v0 = vpack.c.bf16 %v1887_v63, %v1886_v62  ;;  %v1915_v62 = vld [vmem:[%s3190_s5 + $0xe0] sm:$0xff]  ;;  %v1916_v63 = vld [vmem:[%s3190_s5 + $0xe8] sm:$0xff] }
  0x61   : > { %2307 = vmatprep.subr.bf16.mxu1 %v2585_v31 }
  0x64   : > { %2309 = vmatpush1.bf16.msra.mxu1 %v2308_v4  ;;  %v2341_v4 = vpack.c.bf16 %v1889_v3, %v1888_v2 }
  0x65   : > { %2310 = vmatprep.subr.bf16.mxu1 %v2585_v31 }
  0x68   : > { %2312 = vmatpush1.bf16.msra.mxu1 %v2311_v30  ;;  %v1061_v30 = vld [vmem:[%s3190_s5 + $0x28] sm:$0xff] }
  0x69   : > { %2313 = vmatprep.subr.bf16.mxu1 %v2585_v31  ;;  %v2383_v34 = vpack.c.bf16 %v1061_v30, %v1060_v29  ;;  %v1334_v29 = vld [vmem:[#allocation3 + $0x18] sm:$0xff] }
 0x119   : > { %v659_v11 = vpop.f32.mrb[0].mxu0 }
 0x11a   : > { %v661_v13 = vpop.f32.mrb[1].mxu0  ;;  %v686_v14 = vadd.f32 %v679_v10, %v659_v11  ;;  %v1894_v11 = vld [vmem:[%s3189_s4 + $0x1a0] sm:$0xff] }
 0x11b   : > { %v687_v15 = vadd.f32 %v683_v12, %v661_v13 }
 0x11c   : > { %v690_v20 = vmax.f32 %v686_v14, 0.0  ;;  %v1896_v14 = vld [vmem:[%s3189_s4 + $0x1b0] sm:$0xff] }
 0x11d   : > { %v665_v16 = vpop.f32.mrb[2].mxu0  ;;  %v691_v22 = vmax.f32 %v687_v15, 0.0  ;;  %v1897_v15 = vld [vmem:[%s3189_s4 + $0x1b8] sm:$0xff] }
 0x11e   : > { %v688_v17 = vadd.f32 %v679_v10, %v665_v16  ;;  %v667_v18 = vpop.f32.mrb[3].mxu0  ;;  %v2347_v10 = vpack.c.bf16 %v1893_v9, %v1892_v8  ;;  %v2353_v16 = vpack.c.bf16 %v1897_v15, %v1896_v14  ;;  %v1919_v9 = vld [vmem:[%s3190_s5 + $0x100] sm:$0xff] }
 0x11f   : > { %v689_v19 = vadd.f32 %v683_v12, %v667_v18  ;;  %v1895_v12 = vld [vmem:[%s3189_s4 + $0x1a8] sm:$0xff]  ;;  %v1923_v15 = vld [vmem:[%s3190_s5 + $0x120] sm:$0xff] }
 0x120   : > { %v692_v21 = vmax.f32 %v688_v17, 0.0  ;;  %v2350_v13 = vpack.c.bf16 %v1895_v12, %v1894_v11  ;;  %v1056_v17 = vld [vmem:[%s3190_s5] sm:$0xff]  ;;  %v1057_v18 = vld [vmem:[%s3190_s5 + $0x8] sm:$0xff]  ;;  %v1921_v12 = vld [vmem:[%s3190_s5 + $0x110] sm:$0xff] }
 0x121   : > { %v693_v23 = vmax.f32 %v689_v19, 0.0  ;;  %v1899_v19 = vld [vmem:[%s3190_s5 + $0x70] sm:$0xff] }
 0x122   : > { %v2262_v24 = vpack.c.bf16 %v692_v21, %v690_v20  ;;  %v2377_v20 = vpack.c.bf16 %v1057_v18, %v1056_v17  ;;  %v1900_v21 = vld [vmem:[%s3190_s5 + $0x78] sm:$0xff]  ;;  %v1925_v18 = vld [vmem:[%s3190_s5 + $0x130] sm:$0xff] }
 0x123   : > { %v2259_v25 = vpack.c.bf16 %v693_v23, %v691_v22  ;;  %v1058_v22 = vld [vmem:[%s3190_s5 + $0x10] sm:$0xff]  ;;  %v1059_v23 = vld [vmem:[%s3190_s5 + $0x18] sm:$0xff] }
 0x125   : > { %2261 = vmatprep.subr.msk.bf16.mxu0 %vm2260_vm4, %v2259_v25 }
 0x126   : > { %2264 = vmatpush1.bf16.msk.msra.mxu0 %vm2260_vm4, %v2262_v24 }
 0x127   : > { %2267 = vmatprep.subr.msk.bf16.mxu0 %vm2260_vm4, %v2259_v25  ;;  %v1901_v25 = vld [vmem:[%s3190_s5 + $0x80] sm:$0xff] }
 0x129   : > { %1864 = vmatmul.mubr.msk.f32.vlgmr.msra.gmra.mrb[4].mxu0 %vm695_vm5, %v694_v26  ;;  %v1902_v26 = vld [vmem:[%s3190_s5 + $0x88] sm:$0xff] }
 0x12a   : > { %2270 = vmatpush1.bf16.msk.msra.mxu0 %vm2260_vm4, %v2262_v24  ;;  %845 = vmatprep.mubr.f32.mxu0 %v2584_v1  ;;  %v2356_v24 = vpack.c.bf16 %v1900_v21, %v1899_v19  ;;  %v2359_v28 = vpack.c.bf16 %v1902_v26, %v1901_v25  ;;  %v1926_v19 = vld [vmem:[%s3190_s5 + $0x138] sm:$0xff]  ;;  %v1927_v21 = vld [vmem:[%s3190_s5 + $0x140] sm:$0xff]  ;;  %v1332_v26 = vld [vmem:[#allocation3 + $0x8] sm:$0xff] }
 0x12b   : > { %2376 = vmatprep.subr.bf16.mxu0 %v2585_v31  ;;  %v1331_v25 = vld [vmem:[#allocation3] sm:$0xff] }
 0x12d   : > { %1868 = vmatmul.mubr.msk.f32.vlgmr.msra.gmra.mrb[6].mxu0 %vm695_vm5, %v1865_v27  ;;  %v2380_v27 = vpack.c.bf16 %v1059_v23, %v1058_v22  ;;  %v1928_v22 = vld [vmem:[%s3190_s5 + $0x148] sm:$0xff] }
 0x12e   : > { %2378 = vmatpush3.bf16.msra.mxu0 %v2377_v20  ;;  %2098 = vmatprep.mubr.msk.f32.mxu0 %vm2587_vm7, %v2584_v1  ;;  %v2413_v20 = vpack.c.bf16 %v1926_v19, %v1925_v18  ;;  %v2416_v23 = vpack.c.bf16 %v1928_v22, %v1927_v21  ;;  %v1511_v18 = vld [vmem:[#allocation3 + $0xe8] sm:$0xff]  ;;  %v1588_v21 = vld [vmem:[#allocation3 + $0xf8] sm:$0xff] }
 0x12f   : > { %2379 = vmatprep.subr.bf16.mxu0 %v2585_v31 }
 0x132   : > { %2381 = vmatpush3.bf16.msra.mxu0 %v2380_v27  ;;  %v1333_v27 = vld [vmem:[#allocation3 + $0x10] sm:$0xff] }
 0x133   : > { %2382 = vmatprep.subr.bf16.mxu0 %v2585_v31  ;;  %v2422_v30 = vpack.c.bf16 %v1334_v29, %v1333_v27  ;;  %v1591_v27 = vld [vmem:[#allocation3 + $0x110] sm:$0xff] }
 0x136   : > { %2384 = vmatpush3.bf16.msra.mxu0 %v2383_v34 }
 0x137   : > { %2385 = vmatprep.subr.bf16.mxu0 %v2585_v31 }
 0x1fc   : > { %v771_v32 = vpop.f32.mrb[4].mxu0 }
 0x1fd   : > { %v773_v33 = vpop.f32.mrb[5].mxu0 }
 0x200   : > { %v847_v36 = vpop.f32.mrb[6].mxu0 }
 0x201   : > { %v2872_v37 = vmax.f32 %v771_v32, %v847_v36  ;;  %v849_v38 = vpop.f32.mrb[7].mxu0  ;;  %v1903_v32 = vld [vmem:[%s3190_s5 + $0x90] sm:$0xff] }
 0x202   : > { %v853_v39 = vmax.f32 %v773_v33, %v849_v38  ;;  %v1904_v33 = vld [vmem:[%s3190_s5 + $0x98] sm:$0xff]  ;;  %v1062_v36 = vld [vmem:[%s3190_s5 + $0x30] sm:$0xff]  ;;  %v1905_v38 = vld [vmem:[%s3190_s5 + $0xa0] sm:$0xff] }
 0x203   : > { %v2362_v35 = vpack.c.bf16 %v1904_v33, %v1903_v32  ;;  %v1335_v32 = vld [vmem:[#allocation3 + $0x20] sm:$0xff]  ;;  %v1336_v33 = vld [vmem:[#allocation3 + $0x28] sm:$0xff] }
 0x204   : > { %1869 = vmatprep.mubr.msk.f32.mxu1 %vm882_vm6, %v853_v39  ;;  %v2425_v34 = vpack.c.bf16 %v1336_v33, %v1335_v32  ;;  %v1594_v32 = vld [vmem:[#allocation3 + $0x128] sm:$0xff] }
 0x205   : > { %951 = vmatmul.mubr.f32.vlgmr.msra.gmra.mrb[0].mxu1 %v2872_v37 }
 0x206   : > { %2315 = vmatpush1.bf16.msra.mxu1 %v2314_v40  ;;  %1898 = vmatprep.mubr.msk.f32.mxu1 %vm882_vm6, %v853_v39  ;;  %v1906_v39 = vld [vmem:[%s3190_s5 + $0xa8] sm:$0xff] }
 0x207   : > { %2316 = vmatprep.subr.bf16.mxu1 %v2585_v31  ;;  %v2365_v41 = vpack.c.bf16 %v1906_v39, %v1905_v38  ;;  %v1339_v38 = vld [vmem:[#allocation3 + $0x40] sm:$0xff]  ;;  %v1340_v39 = vld [vmem:[#allocation3 + $0x48] sm:$0xff] }
 0x20a   : > { %2318 = vmatpush1.bf16.msra.mxu1 %v2317_v43  ;;  %v1065_v43 = vld [vmem:[%s3190_s5 + $0x48] sm:$0xff] }
 0x20b   : > { %2319 = vmatprep.subr.bf16.mxu1 %v2585_v31 }
 0x20e   : > { %2321 = vmatpush1.bf16.msra.mxu1 %v2320_v46  ;;  %v2389_v46 = vpack.c.bf16 %v1065_v43, %v1064_v42 }
 0x20f   : > { %2322 = vmatprep.subr.bf16.mxu1 %v2585_v31 }
 0x212   : > { %2324 = vmatpush1.bf16.msra.mxu1 %v2323_v49  ;;  %v1067_v49 = vld [vmem:[%s3190_s5 + $0x58] sm:$0xff] }
 0x213   : > { %2325 = vmatprep.subr.bf16.mxu1 %v2585_v31 }
 0x216   : > { %2327 = vmatpush1.bf16.msra.mxu1 %v2326_v52  ;;  %v2392_v52 = vpack.c.bf16 %v1067_v49, %v1066_v48 }
 0x217   : > { %2328 = vmatprep.subr.bf16.mxu1 %v2585_v31 }
 0x21a   : > { %2330 = vmatpush1.bf16.msra.mxu1 %v2329_v55  ;;  %v1069_v55 = vld [vmem:[%s3190_s5 + $0x68] sm:$0xff] }
 0x21b   : > { %2331 = vmatprep.subr.bf16.mxu1 %v2585_v31  ;;  %v2395_v56 = vpack.c.bf16 %v1069_v55, %v1068_v54  ;;  %v1419_v55 = vld [vmem:[#allocation3 + $0x60] sm:$0xff] }
 0x21e   : > { %2333 = vmatpush1.bf16.msra.mxu1 %v2332_v58  ;;  %v1912_v58 = vld [vmem:[%s3190_s5 + $0xd8] sm:$0xff] }
 0x21f   : > { %2334 = vmatprep.subr.bf16.mxu1 %v2585_v31  ;;  %v2374_v59 = vpack.c.bf16 %v1912_v58, %v1911_v57  ;;  %v1421_v58 = vld [vmem:[#allocation3 + $0x70] sm:$0xff] }
 0x222   : > { %2336 = vmatpush1.bf16.msra.mxu1 %v2335_v61 }
 0x223   : > { %2337 = vmatprep.subr.bf16.mxu1 %v2585_v31 }
 0x226   : > { %2339 = vmatpush1.bf16.msra.mxu1 %v2338_v0 }
 0x227   : > { %2340 = vmatprep.subr.bf16.mxu1 %v2585_v31 }
 0x22a   : > { %2342 = vmatpush1.bf16.msra.mxu1 %v2341_v4  ;;  %v2398_v4 = vpack.c.bf16 %v1916_v63, %v1915_v62  ;;  %v1424_v62 = vld [vmem:[#allocation3 + $0x88] sm:$0xff] }
 0x22b   : > { %2343 = vmatprep.subr.bf16.mxu1 %v2585_v31 }
 0x22e   : > { %2345 = vmatpush1.bf16.msra.mxu1 %v2344_v7  ;;  %v1918_v7 = vld [vmem:[%s3190_s5 + $0xf8] sm:$0xff] }
 0x22f   : > { %2346 = vmatprep.subr.bf16.mxu1 %v2585_v31  ;;  %v2401_v8 = vpack.c.bf16 %v1918_v7, %v1917_v6 }
 0x232   : > { %2348 = vmatpush1.bf16.msra.mxu1 %v2347_v10  ;;  %v1920_v10 = vld [vmem:[%s3190_s5 + $0x108] sm:$0xff] }
 0x233   : > { %2349 = vmatprep.subr.bf16.mxu1 %v2585_v31  ;;  %v2404_v11 = vpack.c.bf16 %v1920_v10, %v1919_v9  ;;  %v1505_v9 = vld [vmem:[#allocation3 + $0xb8] sm:$0xff] }
 0x236   : > { %2351 = vmatpush1.bf16.msra.mxu1 %v2350_v13  ;;  %v1922_v13 = vld [vmem:[%s3190_s5 + $0x118] sm:$0xff] }
 0x237   : > { %2352 = vmatprep.subr.bf16.mxu1 %v2585_v31  ;;  %v2407_v14 = vpack.c.bf16 %v1922_v13, %v1921_v12  ;;  %v1507_v12 = vld [vmem:[#allocation3 + $0xc8] sm:$0xff] }
 0x23a   : > { %2354 = vmatpush1.bf16.msra.mxu1 %v2353_v16  ;;  %v1924_v16 = vld [vmem:[%s3190_s5 + $0x128] sm:$0xff] }
 0x23b   : > { %2355 = vmatprep.subr.bf16.mxu1 %v2585_v31  ;;  %v2410_v17 = vpack.c.bf16 %v1924_v16, %v1923_v15  ;;  %v1509_v15 = vld [vmem:[#allocation3 + $0xd8] sm:$0xff] }
 0x23d   : > { %1050 = vmatmul.mubr.f32.vlgmr.msra.gmra.mrb[2].mxu1 %v2872_v37  ;;  %v1063_v37 = vld [vmem:[%s3190_s5 + $0x38] sm:$0xff] }
 0x23e   : > { %2357 = vmatpush3.bf16.msra.mxu1 %v2356_v24  ;;  %v2386_v40 = vpack.c.bf16 %v1063_v37, %v1062_v36  ;;  %2067 = vmatprep.mubr.msk.f32.mxu1 %vm2587_vm7, %v2584_v1  ;;  %v1338_v36 = vld [vmem:[#allocation3 + $0x38] sm:$0xff] }
 0x23f   : > { %2358 = vmatprep.subr.bf16.mxu1 %v2585_v31 }
 0x240   : > { %2387 = vmatpush3.bf16.msra.mxu0 %v2386_v40  ;;  %v2431_v40 = vpack.c.bf16 %v1340_v39, %v1339_v38  ;;  %v1673_v38 = vld [vmem:[#allocation3 + $0x148] sm:$0xff] }
 0x241   : > { %2388 = vmatprep.subr.bf16.mxu0 %v2585_v31 }
 0x242   : > { %2360 = vmatpush3.bf16.msra.mxu1 %v2359_v28  ;;  %v2419_v28 = vpack.c.bf16 %v1332_v26, %v1331_v25  ;;  %v1590_v25 = vld [vmem:[#allocation3 + $0x108] sm:$0xff] }
 0x243   : > { %2361 = vmatprep.subr.bf16.mxu1 %v2585_v31 }
 0x244   : > { %2390 = vmatpush3.bf16.msra.mxu0 %v2389_v46 }
 0x245   : > { %2391 = vmatprep.subr.bf16.mxu0 %v2585_v31 }
 0x246   : > { %2363 = vmatpush3.bf16.msra.mxu1 %v2362_v35  ;;  %v1337_v35 = vld [vmem:[#allocation3 + $0x30] sm:$0xff] }
 0x247   : > { %2364 = vmatprep.subr.bf16.mxu1 %v2585_v31  ;;  %v2428_v37 = vpack.c.bf16 %v1338_v36, %v1337_v35  ;;  %v1596_v35 = vld [vmem:[#allocation3 + $0x138] sm:$0xff] }
 0x248   : > { %2393 = vmatpush3.bf16.msra.mxu0 %v2392_v52 }
 0x249   : > { %2394 = vmatprep.subr.bf16.mxu0 %v2585_v31 }
 0x24a   : > { %2366 = vmatpush3.bf16.msra.mxu1 %v2365_v41 }
 0x24b   : > { %2367 = vmatprep.subr.bf16.mxu1 %v2585_v31 }
 0x24c   : > { %2396 = vmatpush3.bf16.msra.mxu0 %v2395_v56  ;;  %v1420_v56 = vld [vmem:[#allocation3 + $0x68] sm:$0xff] }
 0x24d   : > { %2418 = vmatprep.subr.bf16.mxu0 %v2585_v31  ;;  %v2437_v57 = vpack.c.bf16 %v1420_v56, %v1419_v55  ;;  %v1756_v56 = vld [vmem:[%s3194_s9] sm:$0x1] }
 0x24e   : > { %2369 = vmatpush3.bf16.msra.mxu1 %v2368_v47  ;;  %v1930_v47 = vld [vmem:[%s3191_s6] ss:$0 sm:$0xff] }
 0x24f   : > { %2370 = vmatprep.subr.bf16.mxu1 %v2585_v31 }
 0x252   : > { %2372 = vmatpush3.bf16.msra.mxu1 %v2371_v53  ;;  %v2434_v53 = vpack.c.bf16 %v1418_v51, %v1417_v50  ;;  %v1680_v50 = vld [vmem:[#allocation3 + $0x180] sm:$0xff]  ;;  %v1681_v51 = vld [vmem:[#allocation3 + $0x188] sm:$0xff] }
 0x253   : > { %2373 = vmatprep.subr.bf16.mxu1 %v2585_v31 }
 0x256   : > { %2375 = vmatpush3.bf16.msra.mxu1 %v2374_v59  ;;  %v1422_v59 = vld [vmem:[#allocation3 + $0x78] sm:$0xff] }
 0x257   : > { %2397 = vmatprep.subr.bf16.mxu1 %v2585_v31 }
 0x2d8   : > { %v952_v60 = vpop.f32.mrb[0].mxu1 }
 0x2d9   : > { %v954_v61 = vpop.f32.mrb[1].mxu1 }
 0x2da   : > { %v1423_v61 = vld [vmem:[#allocation3 + $0x80] sm:$0xff] }
 0x2db   : > { %v2443_v63 = vpack.c.bf16 %v1424_v62, %v1423_v61 }
 0x310   : > { %v1051_v0 = vpop.f32.mrb[2].mxu1 }
 0x311   : > { %v1055_v2 = vmax.f32 %v952_v60, %v1051_v0  ;;  %v1053_v3 = vpop.f32.mrb[3].mxu1  ;;  %v2440_v60 = vpack.c.bf16 %v1422_v59, %v1421_v58  ;;  %v1425_v0 = vld [vmem:[#allocation3 + $0x90] sm:$0xff] }
 0x313   : > { %v1086_v5 = vrot.slane %v1055_v2, 1  ;;  %2099 = vmatmul.mubr.msk.f32.vlgmr.msra.gmra.mrb[8].mxu0 %vm1087_vm8, %v1055_v2  ;;  %v1247_v24 = vrot.slane %v1055_v2, 2  ;;  %v1426_v2 = vld [vmem:[#allocation3 + $0x98] sm:$0xff] }
 0x314   : > { %2152 = vmatprep.mubr.msk.f32.mxu0 %vm2587_vm7, %v2584_v1  ;;  %2420 = vmatpush3.bf16.msra.mxu0 %v2419_v28  ;;  %v2446_v3 = vpack.c.bf16 %v1426_v2, %v1425_v0  ;;  %v1592_v28 = vld [vmem:[#allocation3 + $0x118] sm:$0xff] }
 0x315   : > { %2068 = vmatmul.mubr.msk.f32.vlgmr.msra.gmra.mrb[4].mxu1 %vm1087_vm8, %v1086_v5  ;;  %2421 = vmatprep.subr.bf16.mxu0 %v2585_v31  ;;  %v1503_v5 = vld [vmem:[#allocation3 + $0xa8] sm:$0xff]  ;;  %v2470_v29 = vpack.c.bf16 %v1592_v28, %v1591_v27 }
 0x316   : > { %2399 = vmatpush3.bf16.msra.mxu1 %v2398_v4  ;;  %2129 = vmatprep.mubr.msk.f32.mxu1 %vm2587_vm7, %v2584_v1  ;;  %v1502_v4 = vld [vmem:[#allocation3 + $0xa0] sm:$0xff] }
 0x317   : > { %2400 = vmatprep.subr.bf16.mxu1 %v2585_v31  ;;  %v2449_v6 = vpack.c.bf16 %v1503_v5, %v1502_v4 }
 0x318   : > { %2423 = vmatpush3.bf16.msra.mxu0 %v2422_v30  ;;  %v1593_v30 = vld [vmem:[#allocation3 + $0x120] sm:$0xff] }
 0x319   : > { %2424 = vmatprep.subr.bf16.mxu0 %v2585_v31  ;;  %v2473_v33 = vpack.c.bf16 %v1594_v32, %v1593_v30 }
 0x31a   : > { %2402 = vmatpush3.bf16.msra.mxu1 %v2401_v8  ;;  %v1504_v8 = vld [vmem:[#allocation3 + $0xb0] sm:$0xff] }
 0x31b   : > { %2403 = vmatprep.subr.bf16.mxu1 %v2585_v31  ;;  %v2452_v10 = vpack.c.bf16 %v1505_v9, %v1504_v8 }
 0x31c   : > { %2426 = vmatpush3.bf16.msra.mxu0 %v2425_v34  ;;  %v1595_v34 = vld [vmem:[#allocation3 + $0x130] sm:$0xff] }
 0x31d   : > { %2427 = vmatprep.subr.bf16.mxu0 %v2585_v31  ;;  %v2476_v36 = vpack.c.bf16 %v1596_v35, %v1595_v34 }
 0x31e   : > { %2405 = vmatpush3.bf16.msra.mxu1 %v2404_v11  ;;  %v1506_v11 = vld [vmem:[#allocation3 + $0xc0] sm:$0xff] }
 0x31f   : > { %2406 = vmatprep.subr.bf16.mxu1 %v2585_v31  ;;  %v2455_v13 = vpack.c.bf16 %v1507_v12, %v1506_v11 }
 0x320   : > { %2429 = vmatpush3.bf16.msra.mxu0 %v2428_v37  ;;  %v1672_v37 = vld [vmem:[#allocation3 + $0x140] sm:$0xff] }
 0x321   : > { %2430 = vmatprep.subr.bf16.mxu0 %v2585_v31  ;;  %v2479_v39 = vpack.c.bf16 %v1673_v38, %v1672_v37 }
 0x322   : > { %2408 = vmatpush3.bf16.msra.mxu1 %v2407_v14  ;;  %v1508_v14 = vld [vmem:[#allocation3 + $0xd0] sm:$0xff] }
 0x323   : > { %2409 = vmatprep.subr.bf16.mxu1 %v2585_v31  ;;  %v2458_v16 = vpack.c.bf16 %v1509_v15, %v1508_v14 }
 0x324   : > { %2432 = vmatpush3.bf16.msra.mxu0 %v2431_v40 }
 0x325   : > { %2433 = vmatprep.subr.bf16.mxu0 %v2585_v31 }
 0x326   : > { %2411 = vmatpush3.bf16.msra.mxu1 %v2410_v17  ;;  %v1510_v17 = vld [vmem:[#allocation3 + $0xe0] sm:$0xff] }
 0x327   : > { %2412 = vmatprep.subr.bf16.mxu1 %v2585_v31  ;;  %v2461_v19 = vpack.c.bf16 %v1511_v18, %v1510_v17 }
 0x32a   : > { %2414 = vmatpush3.bf16.msra.mxu1 %v2413_v20  ;;  %v1587_v20 = vld [vmem:[#allocation3 + $0xf0] sm:$0xff] }
 0x32b   : > { %2415 = vmatprep.subr.bf16.mxu1 %v2585_v31  ;;  %v2464_v22 = vpack.c.bf16 %v1588_v21, %v1587_v20 }
 0x32e   : > { %2417 = vmatpush3.bf16.msra.mxu1 %v2416_v23 }
 0x331   : > { %2130 = vmatmul.mubr.msk.f32.vlgmr.msra.gmra.mrb[6].mxu1 %vm1087_vm8, %v1247_v24  ;;  %v1589_v24 = vld [vmem:[#allocation3 + $0x100] sm:$0xff] }
 0x332   : > { %v2467_v26 = vpack.c.bf16 %v1590_v25, %v1589_v24 }
 0x3e6   : > { %v1228_v41 = vpop.f32.mrb[8].mxu0 }
 0x3e7   : > { %v2100_v42 = vpop.f32.mrb[9].mxu0 }
 0x3e8   : > { %v1156_v43 = vpop.f32.mrb[4].mxu1  ;;  %v1675_v42 = vld [vmem:[#allocation3 + $0x158] sm:$0xff] }
 0x3e9   : > { %v1229_v44 = vadd.f32 %v1228_v41, %v1156_v43  ;;  %v2069_v45 = vpop.f32.mrb[5].mxu1  ;;  %v1674_v41 = vld [vmem:[#allocation3 + $0x150] sm:$0xff] }
 0x3ea   : > { %v2482_v43 = vpack.c.bf16 %v1675_v42, %v1674_v41  ;;  %v1677_v45 = vld [vmem:[#allocation3 + $0x168] sm:$0xff] }
 0x404   : > { %v1316_v46 = vpop.f32.mrb[6].mxu1 }
 0x405   : > { %v1320_v48 = vadd.f32 %v1316_v46, %v1229_v44  ;;  %v2131_v49 = vpop.f32.mrb[7].mxu1  ;;  %v1676_v44 = vld [vmem:[#allocation3 + $0x160] sm:$0xff] }
 0x406   : > { %v2485_v46 = vpack.c.bf16 %v1677_v45, %v1676_v44 }
 0x407   : > { %v1328_v52 = vadd.f32 %v1930_v47, %v1320_v48  ;;  %v1678_v47 = vld [vmem:[#allocation3 + $0x170] sm:$0xff]  ;;  %v1679_v48 = vld [vmem:[#allocation3 + $0x178] sm:$0xff] }
 0x408   : > { %v2488_v49 = vpack.c.bf16 %v1679_v48, %v1678_v47 }
 0x409   : > { %v3133_v54 = vmax.f32 %v1328_v52, 0.0  ;;  %v2491_v52 = vpack.c.bf16 %v1681_v51, %v1680_v50 }
 0x40b   : > { %2153 = vmatmul.mubr.msk.f32.vlgmr.msra.gmra.mrb[10].mxu0 %vm1341_vm9, %v3133_v54  ;;  %v1427_v7 = vrot.slane %v3133_v54, 1  ;;  %v1512_v23 = vrot.slane %v3133_v54, 2  ;;  %v1597_v40 = vrot.slane %v3133_v54, 3 }
 0x40c   : > { %2435 = vmatpush3.bf16.msra.mxu0 %v2434_v53  ;;  %2175 = vmatprep.mubr.msk.f32.mxu0 %vm2587_vm7, %v2584_v1  ;;  %v1330_v53 = vld [vmem:[%s3193_s8] sm:$0x1] }
 0x40d   : > { %2436 = vmatprep.subr.bf16.mxu0 %v2585_v31 }
 0x410   : > { %2438 = vmatpush3.bf16.msra.mxu0 %v2437_v57 }
 0x411   : > { %2439 = vmatprep.subr.bf16.mxu0 %v2585_v31 }
 0x414   : > { %2441 = vmatpush3.bf16.msra.mxu0 %v2440_v60 }
 0x415   : > { %2442 = vmatprep.subr.bf16.mxu0 %v2585_v31 }
 0x418   : > { %2444 = vmatpush3.bf16.msra.mxu0 %v2443_v63 }
 0x419   : > { %2445 = vmatprep.subr.bf16.mxu0 %v2585_v31 }
 0x41c   : > { %2447 = vmatpush3.bf16.msra.mxu0 %v2446_v3 }
 0x41d   : > { %2448 = vmatprep.subr.bf16.mxu0 %v2585_v31 }
 0x41f   : > { %2176 = vmatmul.mubr.msk.f32.vlgmr.msra.gmra.mrb[10].mxu0 %vm1341_vm9, %v1427_v7 }
 0x420   : > { %2450 = vmatpush3.bf16.msra.mxu0 %v2449_v6  ;;  %2198 = vmatprep.mubr.msk.f32.mxu0 %vm2587_vm7, %v2584_v1 }
 0x421   : > { %2451 = vmatprep.subr.bf16.mxu0 %v2585_v31 }
 0x424   : > { %2453 = vmatpush3.bf16.msra.mxu0 %v2452_v10 }
 0x425   : > { %2454 = vmatprep.subr.bf16.mxu0 %v2585_v31 }
 0x428   : > { %2456 = vmatpush3.bf16.msra.mxu0 %v2455_v13 }
 0x429   : > { %2457 = vmatprep.subr.bf16.mxu0 %v2585_v31 }
 0x42c   : > { %2459 = vmatpush3.bf16.msra.mxu0 %v2458_v16 }
 0x42d   : > { %2460 = vmatprep.subr.bf16.mxu0 %v2585_v31 }
 0x430   : > { %2462 = vmatpush3.bf16.msra.mxu0 %v2461_v19 }
 0x431   : > { %2463 = vmatprep.subr.bf16.mxu0 %v2585_v31 }
 0x433   : > { %2199 = vmatmul.mubr.msk.f32.vlgmr.msra.gmra.mrb[10].mxu0 %vm1341_vm9, %v1512_v23 }
 0x434   : > { %2465 = vmatpush3.bf16.msra.mxu0 %v2464_v22  ;;  %2221 = vmatprep.mubr.msk.f32.mxu0 %vm2587_vm7, %v2584_v1 }
 0x435   : > { %2466 = vmatprep.subr.bf16.mxu0 %v2585_v31 }
 0x438   : > { %2468 = vmatpush3.bf16.msra.mxu0 %v2467_v26 }
 0x439   : > { %2469 = vmatprep.subr.bf16.mxu0 %v2585_v31 }
 0x43c   : > { %2471 = vmatpush3.bf16.msra.mxu0 %v2470_v29 }
 0x43d   : > { %2472 = vmatprep.subr.bf16.mxu0 %v2585_v31 }
 0x440   : > { %2474 = vmatpush3.bf16.msra.mxu0 %v2473_v33 }
 0x441   : > { %2475 = vmatprep.subr.bf16.mxu0 %v2585_v31 }
 0x444   : > { %2477 = vmatpush3.bf16.msra.mxu0 %v2476_v36 }
 0x445   : > { %2478 = vmatprep.subr.bf16.mxu0 %v2585_v31 }
 0x447   : > { %2222 = vmatmul.mubr.msk.f32.vlgmr.msra.gmra.mrb[10].mxu0 %vm1341_vm9, %v1597_v40 }
 0x448   : > { %2480 = vmatpush3.bf16.msra.mxu0 %v2479_v39  ;;  %2244 = vmatprep.mubr.msk.f32.mxu0 %vm2587_vm7, %v2584_v1  ;;  %v1682_v1 = vrot.slane %v3133_v54, 4  ;;  %v1762_v54 = vld [vmem:[#allocation2] sm:$0x1] }
 0x449   : > { %2481 = vmatprep.subr.bf16.mxu0 %v2585_v31 }
 0x44c   : > { %2483 = vmatpush3.bf16.msra.mxu0 %v2482_v43 }
 0x44d   : > { %2484 = vmatprep.subr.bf16.mxu0 %v2585_v31 }
 0x450   : > { %2486 = vmatpush3.bf16.msra.mxu0 %v2485_v46 }
 0x451   : > { %2487 = vmatprep.subr.bf16.mxu0 %v2585_v31 }
 0x454   : > { %2489 = vmatpush3.bf16.msra.mxu0 %v2488_v49 }
 0x455   : > { %2490 = vmatprep.subr.bf16.mxu0 %v2585_v31  ;;  %v2588_v31 = vmov 0  }
 0x456   : > { %2536 = vset.pattern.permute.xlu0 %v2588_v31 }
 0x458   : > { %2492 = vmatpush3.bf16.msra.mxu0 %v2491_v52 }
 0x45b   : > { %2245 = vmatmul.mubr.msk.f32.vlgmr.msra.gmra.mrb[10].mxu0 %vm1341_vm9, %v1682_v1 }
 0x52e   : > { %v1751_v55 = vpop.f32.mrb[10].mxu0 }
 0x52f   : > { %v2493_v57 = vadd.f32 %v1751_v55, %v1330_v53  ;;  %v2246_v58 = vpop.f32.mrb[11].mxu0 }
 0x531   : > { %v1757_v59 = vmul.f32 %v2493_v57, %v1756_v56 }
 0x533   : > { %v1759_v60 = vsel %vm1758_vm10, %v1757_v59, 0.0 }
 0x534   : > { %1760 = vadd.xlane.f32.xlu0 %v1759_v60 }
 0x5c1   : > { %v1761_v61 = vpop.xlane.xlu0 %1760 }
 0x5c2   : > { %v1763_v62 = vadd.f32 %v1762_v54, %v1761_v61 }
 0x5c4   : > { %v1764_v63 = vand.u32 2147483647, %v1763_v62  ;;  %vm1771_vm11 = vcmp.ge.f32.partialorder %v1763_v62, 0.0 }
 0x5c6   : > { %v1765_v0 = vsub.f32 0.0, %v1764_v63 }
 0x5c8   : > { %v1766_v2 = vmul.f32 1.442695, %v1765_v0 }
 0x5ca   : > { %2537 = vpow2.f32 %v1766_v2 }
 0x5d4   : > { %v2538_v3 = vpop.eup %2537 }
 0x5d5   : > { %v1768_v4 = vadd.f32 1.0, %v2538_v3 }
 0x5d7   : > { %2539 = vrcp.f32 %v1768_v4 }
 0x5e1   : > { %v2540_v5 = vpop.eup %2539 }
 0x5e2   : > { %v1772_v6 = vsub.f32 1.0, %v2540_v5 }
 0x5e4   : > { %v1773_v7 = vsel %vm1771_vm11, %v2540_v5, %v1772_v6 }
 0x5e5   : > { %1776 = vperm.xlu0 %2536, %v1773_v7  }
 0x664   : > { %v1777_v8 = vpop.permute.xlu0 %1776 }
 0x665   : > { %1779 = vst [vmem:[%s399_s22] sm:$0x1] %v1777_v8 }
 0x666 PF: > { %s24_s19 = sadd.s32 1, %s2579_s19  }
 0x667   : > { %p21_p3 = scmp.ge.s32.totalorder %s24_s19, 4  }
 0x669   :  { %23 = sbr.rel (!%p21_p3) target bundleno = 4 (0x4), region = 109 }
 0x670   :  { %1797 = vsyncpa [#allocation4], 1 }
 0x671   :  { %1799 = vsyncpa [#allocation4 + $0x1], 1 }

</bundles_post_ra>
